<compile_context>
chip_gen: v6e
topology: v6e:2x2x1
jax: 0.10.0
libtpu: 0.0.40
codegen_flags: <defaults>
</compile_context>

<pallas_src>
import functools

import jax
import jax.numpy as jnp
from jax.experimental import pallas as pl
from jax.experimental.pallas import tpu as pltpu


def _round_up(x, m):
    return (x + m - 1) // m * m


# ----------------------------- fused Pallas kernel ------------------------- #

def _actor_conv_fused_kernel(patches_ref, wc_ref, bc_ref, w1_ref, b1_ref,
                             w2_ref, b2_ref, w3_ref, b3_ref, out_ref,
                             conv_scr):
    """Whole ActorConv forward, everything resident in VMEM.

    patches_ref : (Kp, B*HWp)  im2col patches, zero-padded, lane dim = B*HWp
    wc_ref      : (F, Kp)      conv weight (PyTorch (F,Cin,KH,KW) flattened, zero-padded K)
    bc_ref      : (F, 1)       conv bias (broadcast along lanes)
    w1_ref      : (F, HWp, H1) W1 split per filter: w1_ref[f,p,h] == W1[h, f*HW+p],
                               zeros at padded p
    b1_ref      : (1, H1)
    w2_ref      : (H1, H2), b2_ref : (1, H2)
    w3_ref      : (H2, A),  b3_ref : (1, A)
    out_ref     : (B, A)
    conv_scr    : VMEM scratch (F, B, HWp) — restrides the conv output so the
                  first Linear runs as one f-batched MXU contraction.
    """
    F, B, HWP = conv_scr.shape

    # Conv as ONE lane-dense GEMM over all batches, + bias + ReLU.
    conv_all = jnp.maximum(
        jnp.dot(wc_ref[...], patches_ref[...],
                preferred_element_type=jnp.float32) + bc_ref[...],
        0.0)                                               # (F, B*HWp)

    # Restride (F, B*HWp) -> (F, B, HWp) with B aligned 256-lane stores.
    for b in range(B):
        conv_scr[:, b, :] = conv_all[:, b * HWP:(b + 1) * HWP]

    # First Linear fused with PyTorch's channel-major Flatten:
    #   part[f, b, h] = sum_p conv[f, b, p] * W1[h, f*HW + p]
    # Single f-batched contraction (same dot_general pattern as the
    # flash-attention 'bqk,bkd->bqd' einsum), then one reduce over f.
    part = jax.lax.dot_general(
        conv_scr[...], w1_ref[...],
        dimension_numbers=(((2,), (1,)), ((0,), (0,))),
        preferred_element_type=jnp.float32)                # (F, B, H1)
    h1 = jnp.maximum(jnp.sum(part, axis=0) + b1_ref[...], 0.0)   # (B, H1)

    h2 = jnp.maximum(
        jnp.dot(h1, w2_ref[...], preferred_element_type=jnp.float32)
        + b2_ref[...], 0.0)                                # (B, H2)
    out_ref[...] = (
        jnp.dot(h2, w3_ref[...], preferred_element_type=jnp.float32)
        + b3_ref[...])                                     # (B, A)


def _vmem_spec():
    return pl.BlockSpec(memory_space=pltpu.MemorySpace.VMEM)


# ------------------------------ Model wrapper ------------------------------ #

def init_actor_conv_params(key, *, n_filters, kernel, actor_h1, actor_h2,
                           n_actions, obs_h, obs_w, in_ch=3):
    """Deterministic synthetic parameters in PyTorch layouts."""
    kh, kw = kernel
    hout, wout = obs_h - kh + 1, obs_w - kw + 1
    flat = n_filters * hout * wout
    ks = jax.random.split(key, 8)

    def u(k, shape, fan_in):
        bound = 1.0 / jnp.sqrt(fan_in)
        return jax.random.uniform(k, shape, jnp.float32, -bound, bound)

    return {
        # PyTorch Conv2d weight layout: (F, Cin, KH, KW)
        "wc": u(ks[0], (n_filters, in_ch, kh, kw), in_ch * kh * kw),
        "bc": u(ks[1], (n_filters,), in_ch * kh * kw),
        # PyTorch Linear weight layout: (out, in)
        "w1": u(ks[2], (actor_h1, flat), flat),
        "b1": u(ks[3], (actor_h1,), flat),
        "w2": u(ks[4], (actor_h2, actor_h1), actor_h1),
        "b2": u(ks[5], (actor_h2,), actor_h1),
        "w3": u(ks[6], (n_actions, actor_h2), actor_h2),
        "b3": u(ks[7], (n_actions,), actor_h2),
    }


@functools.partial(jax.jit, static_argnames=("kernel",))
def actor_conv_forward(params, x_nchw, *, kernel):
    """x_nchw: (B, 3, H, W) float32  ->  logits (B, n_actions)."""
    kh, kw = kernel
    b, cin, h, w = x_nchw.shape
    hout, wout = h - kh + 1, w - kw + 1
    hw = hout * wout
    n_filters = params["wc"].shape[0]
    actor_h1 = params["w1"].shape[0]
    actor_h2 = params["w2"].shape[0]
    n_actions = params["w3"].shape[0]
    k = cin * kh * kw

    hwp = _round_up(hw, 128)   # 196 -> 256: lane-aligned spatial blocks
    kp = _round_up(k, 8)       # 27  -> 32 : sublane-aligned contraction

    # TODO(synk): im2col stays as one tiny XLA fusion on the 6 KiB input —
    # building it in-kernel needs a (Hout,Wout)->Hout*Wout minor-dim reshape
    # that Mosaic does not lower reliably.
    cols = []
    for di in range(kh):
        for dj in range(kw):
            cols.append(x_nchw[:, :, di:di + hout, dj:dj + wout])
    # (B, Cin, KH*KW, Hout, Wout) -> (B, K, HW); k = c*KH*KW + di*KW + dj,
    # p = i*Wout + j  (matches the PyTorch weight flatten order).
    patches = jnp.stack(cols, axis=2).reshape(b, k, hw)
    patches = jnp.pad(patches, ((0, 0), (0, kp - k), (0, hwp - hw)))
    # (B, Kp, HWp) -> (Kp, B*HWp): lane index = b*HWp + p, 128-aligned blocks.
    patches2d = patches.transpose(1, 0, 2).reshape(kp, b * hwp)

    wc_mat = jnp.pad(params["wc"].reshape(n_filters, k),
                     ((0, 0), (0, kp - k)))                  # (F, Kp)
    bc_col = params["bc"].reshape(n_filters, 1)              # (F, 1)
    # (H1, F*HW) -> (F, HW, H1): w1r[f, p, h] == W1[h, f*HW + p]; zero-pad p
    # (padded conv lanes hold relu(bias) != 0, so W1 must be zero there).
    w1r = params["w1"].reshape(actor_h1, n_filters, hw).transpose(1, 2, 0)
    w1r = jnp.pad(w1r, ((0, 0), (0, hwp - hw), (0, 0)))      # (F, HWp, H1)
    b1_row = params["b1"].reshape(1, actor_h1)
    w2t = params["w2"].T                                     # (H1, H2)
    b2_row = params["b2"].reshape(1, actor_h2)
    w3t = params["w3"].T                                     # (H2, A)
    b3_row = params["b3"].reshape(1, n_actions)

    flops = 2 * (n_filters * kp * b * hwp
                 + b * n_filters * hwp * actor_h1
                 + b * actor_h1 * actor_h2
                 + b * actor_h2 * n_actions)
    bytes_accessed = 4 * (patches2d.size + wc_mat.size + bc_col.size
                          + w1r.size + b1_row.size + w2t.size + b2_row.size
                          + w3t.size + b3_row.size + b * n_actions)

    # TODO(synk): for tight rollout loops on v5e/v6e, keep the ~0.5 MiB of
    # weights VMEM-resident across calls (cross-call prefetch/futures) instead
    # of re-DMAing them every invocation.
    return pl.pallas_call(
        _actor_conv_fused_kernel,
        out_shape=jax.ShapeDtypeStruct((b, n_actions), jnp.float32),
        in_specs=[_vmem_spec() for _ in range(9)],
        out_specs=_vmem_spec(),
        scratch_shapes=[pltpu.VMEM((n_filters, b, hwp), jnp.float32)],
        cost_estimate=pl.CostEstimate(flops=int(flops), transcendentals=0,
                                      bytes_accessed=int(bytes_accessed)),
    )(patches2d, wc_mat, bc_col, w1r, b1_row, w2t, b2_row, w3t, b3_row)


# ---------------------------- Pure-JAX reference --------------------------- #

def actor_conv_reference(params, x_nchw, *, kernel):
    conv = jax.lax.conv_general_dilated(
        x_nchw, params["wc"], window_strides=(1, 1), padding="VALID",
        dimension_numbers=("NCHW", "OIHW", "NCHW"))
    conv = jnp.maximum(conv + params["bc"][None, :, None, None], 0.0)
    feat = conv.reshape(conv.shape[0], -1)
    h1 = jnp.maximum(feat @ params["w1"].T + params["b1"], 0.0)
    h2 = jnp.maximum(h1 @ params["w2"].T + params["b2"], 0.0)
    return h2 @ params["w3"].T + params["b3"]


# ---------------------------------- Main ----------------------------------- #

if __name__ == "__main__":
    # Small config consistent with the module's scheme/args:
    #   obs_dims = (16, 16), n_actions = 5, n_filters = 8, kernel = (3, 3),
    #   stride = 1, actor_h1 = 64, actor_h2 = 32, batch = 2.
    B, CIN, H, W = 2, 3, 16, 16
    KERNEL = (3, 3)
    N_FILTERS, ACTOR_H1, ACTOR_H2, N_ACTIONS = 8, 64, 32, 5

    key = jax.random.PRNGKey(0)
    k_param, k_x = jax.random.split(key)
    params = init_actor_conv_params(
        k_param, n_filters=N_FILTERS, kernel=KERNEL, actor_h1=ACTOR_H1,
        actor_h2=ACTOR_H2, n_actions=N_ACTIONS, obs_h=H, obs_w=W, in_ch=CIN)

    x = jax.random.normal(k_x, (B, CIN, H, W), jnp.float32)   # NCHW like PyTorch

    out = actor_conv_forward(params, x, kernel=KERNEL)
    out = jax.block_until_ready(out)

    ref = actor_conv_reference(params, x, kernel=KERNEL)
    assert out.shape == (B, N_ACTIONS)
    assert jnp.allclose(out, ref, atol=5e-4, rtol=5e-4), "mismatch vs reference"

    print("KERNEL_OK")
</pallas_src>

<mosaic_0001>
module attributes {stable_mosaic.version = 11 : i64} {
  func.func @_actor_conv_fused_kernel(%arg0: memref<32x512xf32, #tpu.memory_space<vmem>>, %arg1: memref<8x32xf32, #tpu.memory_space<vmem>>, %arg2: memref<8x1xf32, #tpu.memory_space<vmem>>, %arg3: memref<8x256x64xf32, #tpu.memory_space<vmem>>, %arg4: memref<1x64xf32, #tpu.memory_space<vmem>>, %arg5: memref<64x32xf32, #tpu.memory_space<vmem>>, %arg6: memref<1x32xf32, #tpu.memory_space<vmem>>, %arg7: memref<32x5xf32, #tpu.memory_space<vmem>>, %arg8: memref<1x5xf32, #tpu.memory_space<vmem>>, %arg9: memref<2x5xf32, #tpu.memory_space<vmem>>, %arg10: memref<8x2x256xf32, #tpu.memory_space<vmem>>) attributes {dimension_semantics = [], scalar_prefetch = 0 : i64, scratch_operands = 1 : i64, tpu.core_type = #tpu.core_type<tc>} {
    %c0 = arith.constant 0 : index
    %c0_0 = arith.constant 0 : index
    %0 = vector.load %arg1[%c0, %c0_0] : memref<8x32xf32, #tpu.memory_space<vmem>>, vector<8x32xf32>
    %c0_1 = arith.constant 0 : index
    %c0_2 = arith.constant 0 : index
    %1 = vector.load %arg0[%c0_1, %c0_2] : memref<32x512xf32, #tpu.memory_space<vmem>>, vector<32x512xf32>
    %cst = arith.constant dense<0.000000e+00> : vector<8x512xf32>
    %2 = tpu.matmul %0, %1, %cst {dimension_numbers = #tpu.dot_dimension_numbers<[1], [0], [0], [1], [0, 0, 1, 1], [], []>} : vector<8x32xf32>, vector<32x512xf32>, vector<8x512xf32> -> vector<8x512xf32>
    %c0_3 = arith.constant 0 : index
    %c0_4 = arith.constant 0 : index
    %3 = vector.load %arg2[%c0_3, %c0_4] : memref<8x1xf32, #tpu.memory_space<vmem>>, vector<8x1xf32>
    %4 = vector.broadcast %3 : vector<8x1xf32> to vector<8x512xf32>
    %5 = arith.addf %2, %4 : vector<8x512xf32>
    %cst_5 = arith.constant 0.000000e+00 : f32
    %6 = vector.broadcast %cst_5 : f32 to vector<8x512xf32>
    %7 = arith.maximumf %5, %6 : vector<8x512xf32>
    %8 = vector.extract_strided_slice %7 {offsets = [0, 0], sizes = [8, 256], strides = [1, 1]} : vector<8x512xf32> to vector<8x256xf32>
    %c0_6 = arith.constant 0 : index
    %c0_7 = arith.constant 0 : index
    %c0_8 = arith.constant 0 : index
    %9 = vector.load %arg10[%c0_6, %c0_7, %c0_8] : memref<8x2x256xf32, #tpu.memory_space<vmem>>, vector<8x1x256xf32>
    %10 = vector.shape_cast %9 : vector<8x1x256xf32> to vector<8x256xf32>
    %11 = vector.shape_cast %8 : vector<8x256xf32> to vector<8x1x256xf32>
    tpu.vector_store %arg10[%c0_6, %c0_7, %c0_8], %11 {strides = array<i32>} : memref<8x2x256xf32, #tpu.memory_space<vmem>>, vector<8x1x256xf32>,
    %12 = vector.extract_strided_slice %7 {offsets = [0, 256], sizes = [8, 256], strides = [1, 1]} : vector<8x512xf32> to vector<8x256xf32>
    %c0_9 = arith.constant 0 : index
    %c1 = arith.constant 1 : index
    %c0_10 = arith.constant 0 : index
    %13 = vector.load %arg10[%c0_9, %c1, %c0_10] : memref<8x2x256xf32, #tpu.memory_space<vmem>>, vector<8x1x256xf32>
    %14 = vector.shape_cast %13 : vector<8x1x256xf32> to vector<8x256xf32>
    %15 = vector.shape_cast %12 : vector<8x256xf32> to vector<8x1x256xf32>
    tpu.vector_store %arg10[%c0_9, %c1, %c0_10], %15 {strides = array<i32>} : memref<8x2x256xf32, #tpu.memory_space<vmem>>, vector<8x1x256xf32>,
    %c0_11 = arith.constant 0 : index
    %c0_12 = arith.constant 0 : index
    %c0_13 = arith.constant 0 : index
    %16 = vector.load %arg10[%c0_11, %c0_12, %c0_13] : memref<8x2x256xf32, #tpu.memory_space<vmem>>, vector<8x2x256xf32>
    %c0_14 = arith.constant 0 : index
    %c0_15 = arith.constant 0 : index
    %c0_16 = arith.constant 0 : index
    %17 = vector.load %arg3[%c0_14, %c0_15, %c0_16] : memref<8x256x64xf32, #tpu.memory_space<vmem>>, vector<8x256x64xf32>
    %cst_17 = arith.constant dense<0.000000e+00> : vector<8x2x64xf32>
    %18 = tpu.matmul %16, %17, %cst_17 {dimension_numbers = #tpu.dot_dimension_numbers<[2], [1], [1], [2], [0, 0, 0, 1, 1, 2], [0], [0]>} : vector<8x2x256xf32>, vector<8x256x64xf32>, vector<8x2x64xf32> -> vector<8x2x64xf32>
    %cst_18 = arith.constant dense<0.000000e+00> : vector<2x64xf32>
    %19 = vector.multi_reduction <add>, %18, %cst_18 [0] : vector<8x2x64xf32> to vector<2x64xf32>
    %c0_19 = arith.constant 0 : index
    %c0_20 = arith.constant 0 : index
    %20 = vector.load %arg4[%c0_19, %c0_20] : memref<1x64xf32, #tpu.memory_space<vmem>>, vector<1x64xf32>
    %21 = vector.broadcast %20 : vector<1x64xf32> to vector<2x64xf32>
    %22 = arith.addf %19, %21 : vector<2x64xf32>
    %cst_21 = arith.constant 0.000000e+00 : f32
    %23 = vector.broadcast %cst_21 : f32 to vector<2x64xf32>
    %24 = arith.maximumf %22, %23 : vector<2x64xf32>
    %c0_22 = arith.constant 0 : index
    %c0_23 = arith.constant 0 : index
    %25 = vector.load %arg5[%c0_22, %c0_23] : memref<64x32xf32, #tpu.memory_space<vmem>>, vector<64x32xf32>
    %cst_24 = arith.constant dense<0.000000e+00> : vector<2x32xf32>
    %26 = tpu.matmul %24, %25, %cst_24 {dimension_numbers = #tpu.dot_dimension_numbers<[1], [0], [0], [1], [0, 0, 1, 1], [], []>} : vector<2x64xf32>, vector<64x32xf32>, vector<2x32xf32> -> vector<2x32xf32>
    %c0_25 = arith.constant 0 : index
    %c0_26 = arith.constant 0 : index
    %27 = vector.load %arg6[%c0_25, %c0_26] : memref<1x32xf32, #tpu.memory_space<vmem>>, vector<1x32xf32>
    %28 = vector.broadcast %27 : vector<1x32xf32> to vector<2x32xf32>
    %29 = arith.addf %26, %28 : vector<2x32xf32>
    %cst_27 = arith.constant 0.000000e+00 : f32
    %30 = vector.broadcast %cst_27 : f32 to vector<2x32xf32>
    %31 = arith.maximumf %29, %30 : vector<2x32xf32>
    %c0_28 = arith.constant 0 : index
    %c0_29 = arith.constant 0 : index
    %32 = vector.load %arg7[%c0_28, %c0_29] : memref<32x5xf32, #tpu.memory_space<vmem>>, vector<32x5xf32>
    %cst_30 = arith.constant dense<0.000000e+00> : vector<2x5xf32>
    %33 = tpu.matmul %31, %32, %cst_30 {dimension_numbers = #tpu.dot_dimension_numbers<[1], [0], [0], [1], [0, 0, 1, 1], [], []>} : vector<2x32xf32>, vector<32x5xf32>, vector<2x5xf32> -> vector<2x5xf32>
    %c0_31 = arith.constant 0 : index
    %c0_32 = arith.constant 0 : index
    %34 = vector.load %arg8[%c0_31, %c0_32] : memref<1x5xf32, #tpu.memory_space<vmem>>, vector<1x5xf32>
    %35 = vector.broadcast %34 : vector<1x5xf32> to vector<2x5xf32>
    %36 = arith.addf %33, %35 : vector<2x5xf32>
    %c0_33 = arith.constant 0 : index
    %c0_34 = arith.constant 0 : index
    %37 = vector.load %arg9[%c0_33, %c0_34] : memref<2x5xf32, #tpu.memory_space<vmem>>, vector<2x5xf32>
    tpu.vector_store %arg9[%c0_33, %c0_34], %36 {strides = array<i32>} : memref<2x5xf32, #tpu.memory_space<vmem>>, vector<2x5xf32>,
    return
  }
}

</mosaic_0001>

<bundles_post_ra>
// kernel: actor_conv_forward.1
= control target key start
LH: loop header
LB: loop body
LE: loop exit
PB: predicated region body
PF: predicated region fallthrough
CT: control target
= control target key end

     0   :  { %vm56_vm0 = vcmask 261120   ;;  %v1855_v17 = vmov 0.0   ;;  %v1856_v23 = vmov 0   ;;  %s2873_s0 = inlined_call_operand.vmem [shape: f32[32,512], index: 0, kind: input, shape index: {}]   ;;  %s2874_s1 = inlined_call_operand.vmem [shape: f32[8,32], index: 1, kind: input, shape index: {}]   ;;  %s2875_s2 = inlined_call_operand.vmem [shape: f32[8,1], index: 2, kind: input, shape index: {}]   ;;  %s2876_s3 = inlined_call_operand.vmem [shape: f32[8,256,64], index: 3, kind: input, shape index: {}]   ;;  %s2877_s4 = inlined_call_operand.vmem [shape: f32[1,64], index: 4, kind: input, shape index: {}]   ;;  %s2878_s5 = inlined_call_operand.vmem [shape: f32[64,32], index: 5, kind: input, shape index: {}]   ;;  %s2879_s6 = inlined_call_operand.vmem [shape: f32[1,32], index: 6, kind: input, shape index: {}]   ;;  %s2880_s7 = inlined_call_operand.vmem [shape: f32[32,5], index: 7, kind: input, shape index: {}]   ;;  %s2881_s8 = inlined_call_operand.vmem [shape: f32[1,5], index: 8, kind: input, shape index: {}]   ;;  %s2882_s9 = inlined_call_operand.hbm [shape: f32[2,5], index: 9, kind: output, shape index: {}]  }
   0x1   :  { %v47_v0 = vld [vmem:[%s2873_s0 + $0x68] sm:$0xff]  ;;  %v49_v1 = vld [vmem:[%s2873_s0 + $0x78] sm:$0xff]  ;;  %v46_v2 = vld [vmem:[%s2873_s0 + $0x60] sm:$0xff]  ;;  %124 = vmatprep.mubr.f32.mxu0 %v1855_v17  ;;  %195 = vmatprep.mubr.f32.mxu1 %v1855_v17 }
   0x2   :  { %84 = vmatprep.subr.mxu0 %v47_v0  ;;  %155 = vmatprep.subr.mxu1 %v49_v1  ;;  %v48_v3 = vld [vmem:[%s2873_s0 + $0x70] sm:$0xff]  ;;  %v43_v4 = vld [vmem:[%s2873_s0 + $0x48] sm:$0xff]  ;;  %v45_v5 = vld [vmem:[%s2873_s0 + $0x58] sm:$0xff] }
   0x3   :  { %85 = vmatpush1.msra.mxu0 %v46_v2  ;;  %156 = vmatpush1.msra.mxu1 %v48_v3  ;;  %v42_v6 = vld [vmem:[%s2873_s0 + $0x40] sm:$0xff]  ;;  %v44_v7 = vld [vmem:[%s2873_s0 + $0x50] sm:$0xff]  ;;  %v39_v8 = vld [vmem:[%s2873_s0 + $0x28] sm:$0xff] }
   0x4   :  { %86 = vmatprep.subr.mxu0 %v43_v4  ;;  %157 = vmatprep.subr.mxu1 %v45_v5  ;;  %v41_v9 = vld [vmem:[%s2873_s0 + $0x38] sm:$0xff]  ;;  %v38_v10 = vld [vmem:[%s2873_s0 + $0x20] sm:$0xff]  ;;  %v40_v11 = vld [vmem:[%s2873_s0 + $0x30] sm:$0xff] }
   0x5   :  { %87 = vmatpush1.msra.mxu0 %v42_v6  ;;  %158 = vmatpush1.msra.mxu1 %v44_v7  ;;  %v35_v12 = vld [vmem:[%s2873_s0 + $0x8] sm:$0xff]  ;;  %v37_v13 = vld [vmem:[%s2873_s0 + $0x18] sm:$0xff]  ;;  %v34_v14 = vld [vmem:[%s2873_s0] sm:$0xff] }
   0x6   :  { %88 = vmatprep.subr.mxu0 %v39_v8  ;;  %159 = vmatprep.subr.mxu1 %v41_v9  ;;  %v36_v15 = vld [vmem:[%s2873_s0 + $0x10] sm:$0xff]  ;;  %v33_v16 = vld [vmem:[%s2874_s1] sm:$0xff]  ;;  %v400_v18 = vld [vmem:[%s2876_s3 + $0xf8] sm:$0xff] }
   0x7   :  { %89 = vmatpush1.msra.mxu0 %v38_v10  ;;  %160 = vmatpush1.msra.mxu1 %v40_v11  ;;  %v50_v19 = vld [vmem:[%s2875_s2] sm:$0xff]  ;;  %v384_v20 = vld [vmem:[%s2876_s3 + $0x78] sm:$0xff]  ;;  %v399_v21 = vld [vmem:[%s2876_s3 + $0xf0] sm:$0xff] }
   0x8   :  { %90 = vmatprep.subr.mxu0 %v35_v12  ;;  %161 = vmatprep.subr.mxu1 %v37_v13  ;;  %v432_v22 = vld [vmem:[%s2876_s3 + $0x1f8] sm:$0xff]  ;;  %v383_v24 = vld [vmem:[%s2876_s3 + $0x70] sm:$0xff] }
   0x9   :  { %91 = vmatpush1.msra.mxu0 %v34_v14  ;;  %162 = vmatpush1.msra.mxu1 %v36_v15  ;;  %v416_v25 = vld [vmem:[%s2876_s3 + $0x178] sm:$0xff] }
   0xa   :  { %1488 = vmatmul.mubr.msk.f32.vlgmr.msra.gmra.mxu0 %vm56_vm0, %v33_v16  ;;  %1489 = vmatmul.mubr.msk.f32.vlgmr.msra.gmra.mxu1 %vm56_vm0, %v33_v16 }
   0xb   :  { %1832 = vset.pattern.permute.xlu0 %v1856_v23  ;;  %1503 = vmatprep.subr.mxu0 %v400_v18 }
   0xc   :  { %14 = vsyncpa [#allocation4], 0  ;;  %53 = vperm.xlu0 %1832, %v50_v19   ;;  %1504 = vmatpush3.msra.mxu0 %v384_v20  ;;  %v398_v26 = vld [vmem:[%s2876_s3 + $0xe8] sm:$0xff]  ;;  %v431_v27 = vld [vmem:[%s2876_s3 + $0x1f0] sm:$0xff]  ;;  %v1857_v23 = vmov 1966171168  }
   0xd   :  { %1505 = vmatprep.subr.mxu0 %v399_v21  ;;  %1538 = vmatprep.subr.mxu1 %v432_v22  ;;  %v382_v28 = vld [vmem:[%s2876_s3 + $0x68] sm:$0xff]  ;;  %v415_v29 = vld [vmem:[%s2876_s3 + $0x170] sm:$0xff]  ;;  %v397_v30 = vld [vmem:[%s2876_s3 + $0xe0] sm:$0xff]  ;;  %vm1858_vm2 = vmmov 0   ;;  %vm1273_vm3 = vcmask 517120   ;;  %vm1313_vm4 = vcmask 523264  }
   0xe   :  { %1506 = vmatpush3.msra.mxu0 %v383_v24  ;;  %1539 = vmatpush3.msra.mxu1 %v416_v25  ;;  %v430_v31 = vld [vmem:[%s2876_s3 + $0x1e8] sm:$0xff]  ;;  %v381_v32 = vld [vmem:[%s2876_s3 + $0x60] sm:$0xff]  ;;  %v396_v34 = vld [vmem:[%s2876_s3 + $0xd8] sm:$0xff]  ;;  %v211_v24 = vunpack.c.l.s4 %v1857_v23  ;;  %v213_v25 = vlaneseq  ;;  %s1859_s10 = smov [#allocation3]   ;;  %vm1472_vm5 = vcmask 33792  }
   0xf   :  { %1507 = vmatprep.subr.mxu0 %v398_v26  ;;  %1540 = vmatprep.subr.mxu1 %v431_v27  ;;  %v414_v33 = vld [vmem:[%s2876_s3 + $0x168] sm:$0xff]  ;;  %v429_v35 = vld [vmem:[%s2876_s3 + $0x1e0] sm:$0xff]  ;;  %v380_v36 = vld [vmem:[%s2876_s3 + $0x58] sm:$0xff]  ;;  %s1480_s11 = sshll.u32 %s1859_s10, 4  ;;  %s1481_s11 = int_to_ptr.vmem [resolvable:$true] %s1480_s11 }
  0x10   :  { %1508 = vmatpush3.msra.mxu0 %v382_v28  ;;  %1541 = vmatpush3.msra.mxu1 %v415_v29  ;;  %v413_v37 = vld [vmem:[%s2876_s3 + $0x160] sm:$0xff]  ;;  %v395_v38 = vld [vmem:[%s2876_s3 + $0xd0] sm:$0xff]  ;;  %v428_v39 = vld [vmem:[%s2876_s3 + $0x1d8] sm:$0xff]  ;;  %v212_v29 = vunpack.c.0.s8 %v211_v24  ;;  %vm2166_vm1 = vcmp.lt.s32.totalorder %v213_v25, 256  ;;  %p1838_p1 = scmp.lt.s32.totalorder %s1481_s11, %s1481_s11 }
  0x11   :  { %1509 = vmatprep.subr.mxu0 %v397_v30  ;;  %1542 = vmatprep.subr.mxu1 %v430_v31  ;;  %v379_v40 = vld [vmem:[%s2876_s3 + $0x50] sm:$0xff]  ;;  %v412_v41 = vld [vmem:[%s2876_s3 + $0x158] sm:$0xff]  ;;  %v394_v42 = vld [vmem:[%s2876_s3 + $0xc8] sm:$0xff]  ;;  %v214_v30 = vshrl.u32 %v213_v25, 7 }
  0x12   :  { %1510 = vmatpush3.msra.mxu0 %v381_v32  ;;  %1543 = vmatpush3.msra.mxu1 %v414_v33  ;;  %v427_v43 = vld [vmem:[%s2876_s3 + $0x1d0] sm:$0xff]  ;;  %v378_v44 = vld [vmem:[%s2876_s3 + $0x48] sm:$0xff]  ;;  %v393_v46 = vld [vmem:[%s2876_s3 + $0xc0] sm:$0xff] }
  0x13   :  { %1511 = vmatprep.subr.mxu0 %v396_v34  ;;  %1544 = vmatprep.subr.mxu1 %v429_v35  ;;  %v411_v45 = vld [vmem:[%s2876_s3 + $0x150] sm:$0xff]  ;;  %v426_v47 = vld [vmem:[%s2876_s3 + $0x1c8] sm:$0xff]  ;;  %v377_v48 = vld [vmem:[%s2876_s3 + $0x40] sm:$0xff] }
  0x14   :  { %1512 = vmatpush3.msra.mxu0 %v380_v36  ;;  %1545 = vmatpush3.msra.mxu1 %v413_v37  ;;  %v410_v49 = vld [vmem:[%s2876_s3 + $0x148] sm:$0xff]  ;;  %v392_v50 = vld [vmem:[%s2876_s3 + $0xb8] sm:$0xff]  ;;  %v425_v51 = vld [vmem:[%s2876_s3 + $0x1c0] sm:$0xff]  ;;  %v215_v37 = vsub.s32 %v212_v29, %v214_v30 }
  0x15   :  { %1513 = vmatprep.subr.mxu0 %v395_v38  ;;  %1546 = vmatprep.subr.mxu1 %v428_v39  ;;  %v376_v52 = vld [vmem:[%s2876_s3 + $0x38] sm:$0xff]  ;;  %v409_v53 = vld [vmem:[%s2876_s3 + $0x140] sm:$0xff]  ;;  %v391_v54 = vld [vmem:[%s2876_s3 + $0xb0] sm:$0xff] }
  0x16   :  { %1514 = vmatpush3.msra.mxu0 %v379_v40  ;;  %1547 = vmatpush3.msra.mxu1 %v412_v41  ;;  %v424_v55 = vld [vmem:[%s2876_s3 + $0x1b8] sm:$0xff]  ;;  %v375_v56 = vld [vmem:[%s2876_s3 + $0x30] sm:$0xff]  ;;  %v390_v58 = vld [vmem:[%s2876_s3 + $0xa8] sm:$0xff] }
  0x17   :  { %1515 = vmatprep.subr.mxu0 %v394_v42  ;;  %1548 = vmatprep.subr.mxu1 %v427_v43  ;;  %v408_v57 = vld [vmem:[%s2876_s3 + $0x138] sm:$0xff]  ;;  %v423_v59 = vld [vmem:[%s2876_s3 + $0x1b0] sm:$0xff]  ;;  %v374_v60 = vld [vmem:[%s2876_s3 + $0x28] sm:$0xff] }
  0x18   :  { %1516 = vmatpush3.msra.mxu0 %v378_v44  ;;  %1549 = vmatpush3.msra.mxu1 %v411_v45  ;;  %v407_v61 = vld [vmem:[%s2876_s3 + $0x130] sm:$0xff]  ;;  %v389_v62 = vld [vmem:[%s2876_s3 + $0xa0] sm:$0xff]  ;;  %v422_v63 = vld [vmem:[%s2876_s3 + $0x1a8] sm:$0xff] }
  0x19   :  { %1517 = vmatprep.subr.mxu0 %v393_v46  ;;  %1550 = vmatprep.subr.mxu1 %v426_v47  ;;  %v373_v0 = vld [vmem:[%s2876_s3 + $0x20] sm:$0xff]  ;;  %v406_v1 = vld [vmem:[%s2876_s3 + $0x128] sm:$0xff]  ;;  %v388_v2 = vld [vmem:[%s2876_s3 + $0x98] sm:$0xff] }
  0x1a   :  { %1518 = vmatpush3.msra.mxu0 %v377_v48  ;;  %1551 = vmatpush3.msra.mxu1 %v410_v49  ;;  %v421_v3 = vld [vmem:[%s2876_s3 + $0x1a0] sm:$0xff]  ;;  %v372_v4 = vld [vmem:[%s2876_s3 + $0x18] sm:$0xff]  ;;  %v387_v6 = vld [vmem:[%s2876_s3 + $0x90] sm:$0xff] }
  0x1b   :  { %1519 = vmatprep.subr.mxu0 %v392_v50  ;;  %1552 = vmatprep.subr.mxu1 %v425_v51  ;;  %v405_v5 = vld [vmem:[%s2876_s3 + $0x120] sm:$0xff]  ;;  %v420_v7 = vld [vmem:[%s2876_s3 + $0x198] sm:$0xff]  ;;  %v371_v8 = vld [vmem:[%s2876_s3 + $0x10] sm:$0xff] }
  0x1c   :  { %1520 = vmatpush3.msra.mxu0 %v376_v52  ;;  %1553 = vmatpush3.msra.mxu1 %v409_v53  ;;  %v404_v9 = vld [vmem:[%s2876_s3 + $0x118] sm:$0xff]  ;;  %v386_v10 = vld [vmem:[%s2876_s3 + $0x88] sm:$0xff]  ;;  %v419_v11 = vld [vmem:[%s2876_s3 + $0x190] sm:$0xff] }
  0x1d   :  { %1521 = vmatprep.subr.mxu0 %v391_v54  ;;  %1554 = vmatprep.subr.mxu1 %v424_v55  ;;  %v370_v12 = vld [vmem:[%s2876_s3 + $0x8] sm:$0xff]  ;;  %v403_v13 = vld [vmem:[%s2876_s3 + $0x110] sm:$0xff]  ;;  %v385_v14 = vld [vmem:[%s2876_s3 + $0x80] sm:$0xff] }
  0x1e   :  { %1522 = vmatpush3.msra.mxu0 %v375_v56  ;;  %1555 = vmatpush3.msra.mxu1 %v408_v57  ;;  %v418_v15 = vld [vmem:[%s2876_s3 + $0x188] sm:$0xff]  ;;  %v369_v16 = vld [vmem:[%s2876_s3] sm:$0xff]  ;;  %v464_v20 = vld [vmem:[%s2876_s3 + $0x2f8] sm:$0xff] }
  0x1f   :  { %1523 = vmatprep.subr.mxu0 %v390_v58  ;;  %1556 = vmatprep.subr.mxu1 %v423_v59  ;;  %v402_v18 = vld [vmem:[%s2876_s3 + $0x108] sm:$0xff]  ;;  %v417_v19 = vld [vmem:[%s2876_s3 + $0x180] sm:$0xff]  ;;  %v496_v22 = vld [vmem:[%s2876_s3 + $0x3f8] sm:$0xff] }
  0x20   :  { %1524 = vmatpush3.msra.mxu0 %v374_v60  ;;  %1557 = vmatpush3.msra.mxu1 %v407_v61  ;;  %v401_v21 = vld [vmem:[%s2876_s3 + $0x100] sm:$0xff]  ;;  %v479_v23 = vld [vmem:[%s2876_s3 + $0x370] sm:$0xff]  ;;  %v494_v25 = vld [vmem:[%s2876_s3 + $0x3e8] sm:$0xff] }
  0x21   :  { %1525 = vmatprep.subr.mxu0 %v389_v62  ;;  %1558 = vmatprep.subr.mxu1 %v422_v63  ;;  %v461_v24 = vld [vmem:[%s2876_s3 + $0x2e0] sm:$0xff]  ;;  %v444_v30 = vld [vmem:[%s2876_s3 + $0x258] sm:$0xff]  ;;  %v439_v50 = vld [vmem:[%s2876_s3 + $0x230] sm:$0xff] }
  0x22   :  { %1526 = vmatpush3.msra.mxu0 %v373_v0  ;;  %1559 = vmatpush3.msra.mxu1 %v406_v1  ;;  %v493_v29 = vld [vmem:[%s2876_s3 + $0x3e0] sm:$0xff] }
  0x23   :  { %1527 = vmatprep.subr.mxu0 %v388_v2  ;;  %1560 = vmatprep.subr.mxu1 %v421_v3 }
  0x24   :  { %1528 = vmatpush3.msra.mxu0 %v372_v4  ;;  %1561 = vmatpush3.msra.mxu1 %v405_v5 }
  0x25   :  { %1529 = vmatprep.subr.mxu0 %v387_v6  ;;  %1562 = vmatprep.subr.mxu1 %v420_v7 }
  0x26   :  { %1530 = vmatpush3.msra.mxu0 %v371_v8  ;;  %1563 = vmatpush3.msra.mxu1 %v404_v9  ;;  %v448_v9 = vld [vmem:[%s2876_s3 + $0x278] sm:$0xff] }
  0x27   :  { %1531 = vmatprep.subr.mxu0 %v386_v10  ;;  %1564 = vmatprep.subr.mxu1 %v419_v11 }
  0x28   :  { %1532 = vmatpush3.msra.mxu0 %v370_v12  ;;  %1565 = vmatpush3.msra.mxu1 %v403_v13  ;;  %v463_v12 = vld [vmem:[%s2876_s3 + $0x2f0] sm:$0xff] }
  0x29   :  { %1533 = vmatprep.subr.mxu0 %v385_v14  ;;  %1566 = vmatprep.subr.mxu1 %v418_v15  ;;  %v447_v15 = vld [vmem:[%s2876_s3 + $0x270] sm:$0xff] }
  0x2a   :  { %1534 = vmatpush3.msra.mxu0 %v369_v16  ;;  %1567 = vmatpush3.msra.mxu1 %v402_v18  ;;  %v480_v18 = vld [vmem:[%s2876_s3 + $0x378] sm:$0xff] }
  0x2b   :  { %1568 = vmatprep.subr.mxu1 %v417_v19  ;;  %1573 = vmatprep.subr.mxu0 %v464_v20  ;;  %v462_v19 = vld [vmem:[%s2876_s3 + $0x2e8] sm:$0xff] }
  0x2c   :  { %1569 = vmatpush3.msra.mxu1 %v401_v21  ;;  %v495_v21 = vld [vmem:[%s2876_s3 + $0x3f0] sm:$0xff] }
  0x2d   :  { %1608 = vmatprep.subr.mxu1 %v496_v22  ;;  %v446_v22 = vld [vmem:[%s2876_s3 + $0x268] sm:$0xff] }
  0x87   :  { %v54_v26 = vpop.permute.xlu0 %53 }
  0xca   :  { %v126_v27 = vpop.f32.mrf.mxu0  ;;  %v197_v28 = vpop.f32.mrf.mxu1 }
  0xcb   :  { %v127_v31 = vadd.f32 %v126_v27, %v54_v26  ;;  %v198_v32 = vadd.f32 %v197_v28, %v54_v26  ;;  %v478_v27 = vld [vmem:[%s2876_s3 + $0x368] sm:$0xff]  ;;  %v460_v28 = vld [vmem:[%s2876_s3 + $0x2d8] sm:$0xff] }
  0xcc   :  { %v128_v33 = vpop.f32.mrf.mxu0  ;;  %v199_v34 = vpop.f32.mrf.mxu1 }
  0xcd   :  { %v129_v35 = vadd.f32 %v128_v33, %v54_v26  ;;  %v200_v36 = vadd.f32 %v199_v34, %v54_v26  ;;  %v202_v38 = vmax.f32 %v127_v31, 0.0  ;;  %v204_v39 = vmax.f32 %v198_v32, 0.0  ;;  %v445_v26 = vld [vmem:[%s2876_s3 + $0x260] sm:$0xff]  ;;  %v459_v32 = vld [vmem:[%s2876_s3 + $0x2d0] sm:$0xff]  ;;  %v492_v33 = vld [vmem:[%s2876_s3 + $0x3d8] sm:$0xff] }
  0xce   :  { %v477_v31 = vld [vmem:[%s2876_s3 + $0x360] sm:$0xff]  ;;  %v443_v34 = vld [vmem:[%s2876_s3 + $0x250] sm:$0xff] }
  0xcf   :  { %v203_v40 = vmax.f32 %v129_v35, 0.0  ;;  %v205_v41 = vmax.f32 %v200_v36, 0.0  ;;  %v476_v35 = vld [vmem:[%s2876_s3 + $0x358] sm:$0xff]  ;;  %v458_v36 = vld [vmem:[%s2876_s3 + $0x2c8] sm:$0xff] }
  0xd1   :  { %v208_v42 = vcombine.low %v202_v38, %v203_v40  ;;  %v209_v43 = vcombine.high %v202_v38, %v203_v40  ;;  %v287_v44 = vcombine.low %v204_v39, %v205_v41  ;;  %v288_v45 = vcombine.high %v204_v39, %v205_v41  ;;  %v442_v38 = vld [vmem:[%s2876_s3 + $0x248] sm:$0xff]  ;;  %v475_v39 = vld [vmem:[%s2876_s3 + $0x350] sm:$0xff]  ;;  %v457_v40 = vld [vmem:[%s2876_s3 + $0x2c0] sm:$0xff] }
  0xd2   :  { %v490_v41 = vld [vmem:[%s2876_s3 + $0x3c8] sm:$0xff] }
  0xd3   :  { %v216_v46 = vrot.slane %v208_v42, %v215_v37  ;;  %v223_v47 = vrot.slane %v209_v43, %v215_v37  ;;  %v295_v48 = vrot.slane %v287_v44, %v215_v37  ;;  %v302_v49 = vrot.slane %v288_v45, %v215_v37  ;;  %v441_v42 = vld [vmem:[%s2876_s3 + $0x240] sm:$0xff]  ;;  %v474_v43 = vld [vmem:[%s2876_s3 + $0x348] sm:$0xff]  ;;  %v456_v44 = vld [vmem:[%s2876_s3 + $0x2b8] sm:$0xff] }
  0xd4   :  { %v489_v45 = vld [vmem:[%s2876_s3 + $0x3c0] sm:$0xff] }
  0xd5   :  { %v224_v51 = vcombine.high %v216_v46, %v216_v46  ;;  %v225_v52 = vcombine.high %v223_v47, %v223_v47  ;;  %v232_v53 = vrot.slane %v216_v46, %v215_v37  ;;  %v239_v54 = vrot.slane %v223_v47, %v215_v37  ;;  %v440_v46 = vld [vmem:[%s2876_s3 + $0x238] sm:$0xff]  ;;  %v473_v47 = vld [vmem:[%s2876_s3 + $0x340] sm:$0xff] }
  0xd6   :  { %v303_v55 = vcombine.high %v295_v48, %v295_v48  ;;  %v304_v56 = vcombine.high %v302_v49, %v302_v49  ;;  %v311_v57 = vrot.slane %v295_v48, %v215_v37  ;;  %v318_v58 = vrot.slane %v302_v49, %v215_v37  ;;  %v455_v48 = vld [vmem:[%s2876_s3 + $0x2b0] sm:$0xff]  ;;  %v488_v49 = vld [vmem:[%s2876_s3 + $0x3b8] sm:$0xff] }
  0xd7   :  { %v246_v59 = vrot.slane %v224_v51, %v215_v37  ;;  %v253_v60 = vrot.slane %v225_v52, %v215_v37  ;;  %v254_v61 = vcombine.high %v232_v53, %v232_v53  ;;  %v255_v62 = vcombine.high %v239_v54, %v239_v54  ;;  %270 = vst.msk [vmem:[#allocation2] ss:$2 sm:$0x3] %vm2166_vm1, %v232_v53  ;;  %v472_v51 = vld [vmem:[%s2876_s3 + $0x338] sm:$0xff]  ;;  %v454_v52 = vld [vmem:[%s2876_s3 + $0x2a8] sm:$0xff]  ;;  %v487_v53 = vld [vmem:[%s2876_s3 + $0x3b0] sm:$0xff] }
  0xd8   :  { %278 = vst.msk [vmem:[#allocation2 + $0x10] ss:$2 sm:$0x3] %vm2166_vm1, %v239_v54  ;;  %v325_v63 = vrot.slane %v303_v55, %v215_v37  ;;  %v332_v0 = vrot.slane %v304_v56, %v215_v37  ;;  %v333_v1 = vcombine.high %v311_v57, %v311_v57  ;;  %v334_v2 = vcombine.high %v318_v58, %v318_v58  ;;  %v491_v37 = vld [vmem:[%s2876_s3 + $0x3d0] sm:$0xff]  ;;  %v438_v54 = vld [vmem:[%s2876_s3 + $0x228] sm:$0xff]  ;;  %v453_v56 = vld [vmem:[%s2876_s3 + $0x2a0] sm:$0xff] }
  0xd9   :  { %346 = vst.msk [vmem:[#allocation2 + $0x1] ss:$2 sm:$0x3] %vm2166_vm1, %v311_v57  ;;  %354 = vst.msk [vmem:[#allocation2 + $0x11] ss:$2 sm:$0x3] %vm2166_vm1, %v318_v58  ;;  %v256_v3 = vcombine.high %v246_v59, %v246_v59  ;;  %v257_v4 = vcombine.high %v253_v60, %v253_v60 }
  0xda   :  { %272 = vst.msk [vmem:[#allocation2 + $0x4] ss:$2 sm:$0x3] %vm2166_vm1, %v246_v59  ;;  %274 = vst.msk [vmem:[#allocation2 + $0x8] ss:$2 sm:$0x3] %vm2166_vm1, %v254_v61  ;;  %v335_v5 = vcombine.high %v325_v63, %v325_v63  ;;  %v336_v6 = vcombine.high %v332_v0, %v332_v0 }
  0xdb   :  { %280 = vst.msk [vmem:[#allocation2 + $0x14] ss:$2 sm:$0x3] %vm2166_vm1, %v253_v60  ;;  %282 = vst.msk [vmem:[#allocation2 + $0x18] ss:$2 sm:$0x3] %vm2166_vm1, %v255_v62 }
  0xdc   :  { %348 = vst.msk [vmem:[#allocation2 + $0x5] ss:$2 sm:$0x3] %vm2166_vm1, %v325_v63  ;;  %350 = vst.msk [vmem:[#allocation2 + $0x9] ss:$2 sm:$0x3] %vm2166_vm1, %v333_v1 }
  0xdd   :  { %356 = vst.msk [vmem:[#allocation2 + $0x15] ss:$2 sm:$0x3] %vm2166_vm1, %v332_v0  ;;  %358 = vst.msk [vmem:[#allocation2 + $0x19] ss:$2 sm:$0x3] %vm2166_vm1, %v334_v2 }
  0xde   :  { %276 = vst.msk [vmem:[#allocation2 + $0xc] ss:$2 sm:$0x3] %vm2166_vm1, %v256_v3  ;;  %284 = vst.msk [vmem:[#allocation2 + $0x1c] ss:$2 sm:$0x3] %vm2166_vm1, %v257_v4 }
  0xdf   :  { %352 = vst.msk [vmem:[#allocation2 + $0xd] ss:$2 sm:$0x3] %vm2166_vm1, %v335_v5  ;;  %360 = vst.msk [vmem:[#allocation2 + $0x1d] ss:$2 sm:$0x3] %vm2166_vm1, %v336_v6 }
  0xe0   :  { %v1490_v7 = vld.sshfl [vmem:[#allocation2] sm:$0x33 pattern:$0x76325410]  ;;  %v471_v55 = vld [vmem:[%s2876_s3 + $0x330] sm:$0xff]  ;;  %v486_v57 = vld [vmem:[%s2876_s3 + $0x3a8] sm:$0xff] }
  0xe1   :  { %v633_v8 = vcombine.high %v1490_v7, %v1490_v7  ;;  %v437_v58 = vld [vmem:[%s2876_s3 + $0x220] sm:$0xff]  ;;  %v470_v59 = vld [vmem:[%s2876_s3 + $0x328] sm:$0xff]  ;;  %v452_v60 = vld [vmem:[%s2876_s3 + $0x298] sm:$0xff] }
  0xe2   :  { %v485_v61 = vld [vmem:[%s2876_s3 + $0x3a0] sm:$0xff]  ;;  %v436_v62 = vld [vmem:[%s2876_s3 + $0x218] sm:$0xff]  ;;  %v451_v0 = vld [vmem:[%s2876_s3 + $0x290] sm:$0xff] }
  0xe3   :  { %v1491_v10 = vld.sshfl [vmem:[#allocation2 + $0x4] sm:$0x33 pattern:$0x76325410]  ;;  %700 = vmatprep.mubr.f32.mxu0 %v633_v8  ;;  %v484_v1 = vld [vmem:[%s2876_s3 + $0x398] sm:$0xff]  ;;  %v435_v2 = vld [vmem:[%s2876_s3 + $0x210] sm:$0xff] }
  0xe4   :  { %v714_v11 = vcombine.high %v1491_v10, %v1491_v10  ;;  %v2208_v13 = vld.sshfl [vmem:[#allocation2 + $0x8] sm:$0x33 pattern:$0x76325410]  ;;  %701 = vmatmul.mubr.f32.vlgmr.msra.gmra.mxu0 %v1490_v7  ;;  %v469_v63 = vld [vmem:[%s2876_s3 + $0x320] sm:$0xff]  ;;  %v468_v3 = vld [vmem:[%s2876_s3 + $0x318] sm:$0xff] }
  0xe5   :  { %v795_v14 = vcombine.high %v2208_v13, %v2208_v13  ;;  %1574 = vmatpush3.msra.mxu0 %v448_v9  ;;  %v450_v4 = vld [vmem:[%s2876_s3 + $0x288] sm:$0xff]  ;;  %v483_v5 = vld [vmem:[%s2876_s3 + $0x390] sm:$0xff]  ;;  %v449_v8 = vld [vmem:[%s2876_s3 + $0x280] sm:$0xff] }
  0xe6   :  { %v2215_v16 = vld.sshfl [vmem:[#allocation2 + $0xc] sm:$0x33 pattern:$0x76325410]  ;;  %781 = vmatprep.mubr.f32.mxu1 %v714_v11  ;;  %1575 = vmatprep.subr.mxu0 %v463_v12  ;;  %v467_v7 = vld [vmem:[%s2876_s3 + $0x310] sm:$0xff]  ;;  %v481_v12 = vld [vmem:[%s2876_s3 + $0x380] sm:$0xff] }
  0xe7   :  { %v876_v20 = vcombine.high %v2215_v16, %v2215_v16  ;;  %862 = vmatprep.mubr.f32.mxu0 %v795_v14  ;;  %782 = vmatmul.mubr.f32.vlgmr.msra.gmra.mxu1 %v1491_v10  ;;  %v434_v6 = vld [vmem:[%s2876_s3 + $0x208] sm:$0xff]  ;;  %v433_v10 = vld [vmem:[%s2876_s3 + $0x200] sm:$0xff]  ;;  %v2393_v14 = vld.sshfl [vmem:[#allocation2 + $0x10] sm:$0x33 pattern:$0x76325410] }
  0xe8   :  { %1576 = vmatpush3.msra.mxu0 %v447_v15  ;;  %1609 = vmatpush3.msra.mxu1 %v480_v18  ;;  %v482_v9 = vld [vmem:[%s2876_s3 + $0x388] sm:$0xff]  ;;  %v528_v15 = vld [vmem:[%s2876_s3 + $0x4f8] sm:$0xff]  ;;  %v465_v18 = vld [vmem:[%s2876_s3 + $0x300] sm:$0xff] }
  0xe9   :  { %1577 = vmatprep.subr.mxu0 %v462_v19  ;;  %1610 = vmatprep.subr.mxu1 %v495_v21  ;;  %v466_v11 = vld [vmem:[%s2876_s3 + $0x308] sm:$0xff]  ;;  %v512_v19 = vld [vmem:[%s2876_s3 + $0x478] sm:$0xff]  ;;  %v527_v21 = vld [vmem:[%s2876_s3 + $0x4f0] sm:$0xff] }
  0xea   :  { %943 = vmatprep.mubr.f32.mxu1 %v876_v20  ;;  %1578 = vmatpush3.msra.mxu0 %v446_v22  ;;  %v957_v20 = vcombine.high %v2393_v14, %v2393_v14  ;;  %v2410_v22 = vld.sshfl [vmem:[#allocation2 + $0x14] sm:$0x33 pattern:$0x76325410] }
  0xeb   :  { %1611 = vmatpush3.msra.mxu1 %v479_v23  ;;  %1579 = vmatprep.subr.mxu0 %v461_v24  ;;  %v560_v23 = vld [vmem:[%s2876_s3 + $0x5f8] sm:$0xff] }
  0xec   :  { %1612 = vmatprep.subr.mxu1 %v494_v25  ;;  %1580 = vmatpush3.msra.mxu0 %v445_v26  ;;  %v544_v24 = vld [vmem:[%s2876_s3 + $0x578] sm:$0xff]  ;;  %v1038_v25 = vcombine.high %v2410_v22, %v2410_v22  ;;  %v526_v26 = vld [vmem:[%s2876_s3 + $0x4e8] sm:$0xff] }
  0xed   :  { %1613 = vmatpush3.msra.mxu1 %v478_v27  ;;  %1581 = vmatprep.subr.mxu0 %v460_v28  ;;  %v559_v27 = vld [vmem:[%s2876_s3 + $0x5f0] sm:$0xff]  ;;  %v510_v28 = vld [vmem:[%s2876_s3 + $0x468] sm:$0xff] }
  0xee   :  { %1614 = vmatprep.subr.mxu1 %v493_v29  ;;  %1582 = vmatpush3.msra.mxu0 %v444_v30  ;;  %v525_v29 = vld [vmem:[%s2876_s3 + $0x4e0] sm:$0xff]  ;;  %v558_v30 = vld [vmem:[%s2876_s3 + $0x5e8] sm:$0xff] }
  0xef   :  { %1615 = vmatpush3.msra.mxu1 %v477_v31  ;;  %1583 = vmatprep.subr.mxu0 %v459_v32  ;;  %v509_v31 = vld [vmem:[%s2876_s3 + $0x460] sm:$0xff]  ;;  %v542_v32 = vld [vmem:[%s2876_s3 + $0x568] sm:$0xff] }
  0xf0   :  { %1616 = vmatprep.subr.mxu1 %v492_v33  ;;  %1584 = vmatpush3.msra.mxu0 %v443_v34  ;;  %v524_v33 = vld [vmem:[%s2876_s3 + $0x4d8] sm:$0xff]  ;;  %v557_v34 = vld [vmem:[%s2876_s3 + $0x5e0] sm:$0xff] }
  0xf1   :  { %1617 = vmatpush3.msra.mxu1 %v476_v35  ;;  %1585 = vmatprep.subr.mxu0 %v458_v36  ;;  %v508_v35 = vld [vmem:[%s2876_s3 + $0x458] sm:$0xff]  ;;  %v541_v36 = vld [vmem:[%s2876_s3 + $0x560] sm:$0xff] }
  0xf2   :  { %1618 = vmatprep.subr.mxu1 %v491_v37  ;;  %1586 = vmatpush3.msra.mxu0 %v442_v38  ;;  %v523_v37 = vld [vmem:[%s2876_s3 + $0x4d0] sm:$0xff]  ;;  %v556_v38 = vld [vmem:[%s2876_s3 + $0x5d8] sm:$0xff] }
  0xf3   :  { %1619 = vmatpush3.msra.mxu1 %v475_v39  ;;  %1587 = vmatprep.subr.mxu0 %v457_v40  ;;  %v507_v39 = vld [vmem:[%s2876_s3 + $0x450] sm:$0xff]  ;;  %v540_v40 = vld [vmem:[%s2876_s3 + $0x558] sm:$0xff] }
  0xf4   :  { %1620 = vmatprep.subr.mxu1 %v490_v41  ;;  %1588 = vmatpush3.msra.mxu0 %v441_v42  ;;  %v522_v41 = vld [vmem:[%s2876_s3 + $0x4c8] sm:$0xff]  ;;  %v555_v42 = vld [vmem:[%s2876_s3 + $0x5d0] sm:$0xff] }
  0xf5   :  { %1621 = vmatpush3.msra.mxu1 %v474_v43  ;;  %1589 = vmatprep.subr.mxu0 %v456_v44  ;;  %v506_v43 = vld [vmem:[%s2876_s3 + $0x448] sm:$0xff]  ;;  %v539_v44 = vld [vmem:[%s2876_s3 + $0x550] sm:$0xff] }
  0xf6   :  { %1622 = vmatprep.subr.mxu1 %v489_v45  ;;  %1590 = vmatpush3.msra.mxu0 %v440_v46  ;;  %v521_v45 = vld [vmem:[%s2876_s3 + $0x4c0] sm:$0xff]  ;;  %v554_v46 = vld [vmem:[%s2876_s3 + $0x5c8] sm:$0xff] }
  0xf7   :  { %1623 = vmatpush3.msra.mxu1 %v473_v47  ;;  %1591 = vmatprep.subr.mxu0 %v455_v48  ;;  %v505_v47 = vld [vmem:[%s2876_s3 + $0x440] sm:$0xff]  ;;  %v538_v48 = vld [vmem:[%s2876_s3 + $0x548] sm:$0xff] }
  0xf8   :  { %1624 = vmatprep.subr.mxu1 %v488_v49  ;;  %1592 = vmatpush3.msra.mxu0 %v439_v50  ;;  %v520_v49 = vld [vmem:[%s2876_s3 + $0x4b8] sm:$0xff]  ;;  %v553_v50 = vld [vmem:[%s2876_s3 + $0x5c0] sm:$0xff] }
  0xf9   :  { %1625 = vmatpush3.msra.mxu1 %v472_v51  ;;  %1593 = vmatprep.subr.mxu0 %v454_v52  ;;  %v504_v51 = vld [vmem:[%s2876_s3 + $0x438] sm:$0xff]  ;;  %v537_v52 = vld [vmem:[%s2876_s3 + $0x540] sm:$0xff] }
  0xfa   :  { %1626 = vmatprep.subr.mxu1 %v487_v53  ;;  %1594 = vmatpush3.msra.mxu0 %v438_v54  ;;  %v519_v53 = vld [vmem:[%s2876_s3 + $0x4b0] sm:$0xff]  ;;  %v552_v54 = vld [vmem:[%s2876_s3 + $0x5b8] sm:$0xff] }
  0xfb   :  { %1627 = vmatpush3.msra.mxu1 %v471_v55  ;;  %1595 = vmatprep.subr.mxu0 %v453_v56  ;;  %v503_v55 = vld [vmem:[%s2876_s3 + $0x430] sm:$0xff]  ;;  %v536_v56 = vld [vmem:[%s2876_s3 + $0x538] sm:$0xff] }
  0xfc   :  { %1628 = vmatprep.subr.mxu1 %v486_v57  ;;  %1596 = vmatpush3.msra.mxu0 %v437_v58  ;;  %v518_v57 = vld [vmem:[%s2876_s3 + $0x4a8] sm:$0xff]  ;;  %v551_v58 = vld [vmem:[%s2876_s3 + $0x5b0] sm:$0xff] }
  0xfd   :  { %1629 = vmatpush3.msra.mxu1 %v470_v59  ;;  %1597 = vmatprep.subr.mxu0 %v452_v60  ;;  %v502_v59 = vld [vmem:[%s2876_s3 + $0x428] sm:$0xff]  ;;  %v535_v60 = vld [vmem:[%s2876_s3 + $0x530] sm:$0xff] }
  0xfe   :  { %1630 = vmatprep.subr.mxu1 %v485_v61  ;;  %1598 = vmatpush3.msra.mxu0 %v436_v62  ;;  %v517_v61 = vld [vmem:[%s2876_s3 + $0x4a0] sm:$0xff]  ;;  %v550_v62 = vld [vmem:[%s2876_s3 + $0x5a8] sm:$0xff] }
  0xff   :  { %1631 = vmatpush3.msra.mxu1 %v469_v63  ;;  %1599 = vmatprep.subr.mxu0 %v451_v0  ;;  %v501_v63 = vld [vmem:[%s2876_s3 + $0x420] sm:$0xff]  ;;  %v534_v0 = vld [vmem:[%s2876_s3 + $0x528] sm:$0xff] }
 0x100   :  { %1632 = vmatprep.subr.mxu1 %v484_v1  ;;  %1600 = vmatpush3.msra.mxu0 %v435_v2  ;;  %v516_v1 = vld [vmem:[%s2876_s3 + $0x498] sm:$0xff]  ;;  %v549_v2 = vld [vmem:[%s2876_s3 + $0x5a0] sm:$0xff] }
 0x101   :  { %1633 = vmatpush3.msra.mxu1 %v468_v3  ;;  %1601 = vmatprep.subr.mxu0 %v450_v4  ;;  %v500_v3 = vld [vmem:[%s2876_s3 + $0x418] sm:$0xff]  ;;  %v533_v4 = vld [vmem:[%s2876_s3 + $0x520] sm:$0xff] }
 0x102   :  { %1634 = vmatprep.subr.mxu1 %v483_v5  ;;  %1602 = vmatpush3.msra.mxu0 %v434_v6  ;;  %v515_v5 = vld [vmem:[%s2876_s3 + $0x490] sm:$0xff]  ;;  %v548_v6 = vld [vmem:[%s2876_s3 + $0x598] sm:$0xff] }
 0x103   :  { %1635 = vmatpush3.msra.mxu1 %v467_v7  ;;  %1603 = vmatprep.subr.mxu0 %v449_v8  ;;  %v499_v7 = vld [vmem:[%s2876_s3 + $0x410] sm:$0xff]  ;;  %v532_v8 = vld [vmem:[%s2876_s3 + $0x518] sm:$0xff] }
 0x104   :  { %1636 = vmatprep.subr.mxu1 %v482_v9  ;;  %1604 = vmatpush3.msra.mxu0 %v433_v10  ;;  %v514_v9 = vld [vmem:[%s2876_s3 + $0x488] sm:$0xff]  ;;  %v547_v10 = vld [vmem:[%s2876_s3 + $0x590] sm:$0xff] }
 0x105   :  { %1637 = vmatpush3.msra.mxu1 %v466_v11  ;;  %863 = vmatmul.mubr.f32.vlgmr.msra.gmra.mxu0 %v2208_v13  ;;  %v511_v13 = vld [vmem:[%s2876_s3 + $0x470] sm:$0xff]  ;;  %v498_v11 = vld [vmem:[%s2876_s3 + $0x408] sm:$0xff] }
 0x106   :  { %1638 = vmatprep.subr.mxu1 %v481_v12  ;;  %1643 = vmatprep.subr.mxu0 %v528_v15  ;;  %v531_v12 = vld [vmem:[%s2876_s3 + $0x510] sm:$0xff]  ;;  %v513_v15 = vld [vmem:[%s2876_s3 + $0x480] sm:$0xff] }
 0x107   :  { %1639 = vmatpush3.msra.mxu1 %v465_v18  ;;  %1644 = vmatpush3.msra.mxu0 %v512_v19  ;;  %v546_v18 = vld [vmem:[%s2876_s3 + $0x588] sm:$0xff]  ;;  %v497_v19 = vld [vmem:[%s2876_s3 + $0x400] sm:$0xff] }
 0x108   :  { %1024 = vmatprep.mubr.f32.mxu0 %v957_v20  ;;  %944 = vmatmul.mubr.f32.vlgmr.msra.gmra.mxu1 %v2215_v16  ;;  %v543_v16 = vld [vmem:[%s2876_s3 + $0x570] sm:$0xff]  ;;  %v530_v20 = vld [vmem:[%s2876_s3 + $0x508] sm:$0xff] }
 0x109   :  { %1645 = vmatprep.subr.mxu0 %v527_v21  ;;  %1678 = vmatprep.subr.mxu1 %v560_v23  ;;  %v545_v21 = vld [vmem:[%s2876_s3 + $0x580] sm:$0xff]  ;;  %v2595_v23 = vld.sshfl [vmem:[#allocation2 + $0x18] sm:$0x33 pattern:$0x76325410] }
 0x10a   :  { %1646 = vmatpush3.msra.mxu0 %v511_v13  ;;  %1679 = vmatpush3.msra.mxu1 %v544_v24  ;;  %v592_v13 = vld [vmem:[%s2876_s3 + $0x6f8] sm:$0xff]  ;;  %v529_v24 = vld [vmem:[%s2876_s3 + $0x500] sm:$0xff] }
 0x10b   :  { %1105 = vmatprep.mubr.f32.mxu1 %v1038_v25  ;;  %1647 = vmatprep.subr.mxu0 %v526_v26  ;;  %v576_v25 = vld [vmem:[%s2876_s3 + $0x678] sm:$0xff]  ;;  %v1119_v26 = vcombine.high %v2595_v23, %v2595_v23 }
 0x10c   :  { %1680 = vmatprep.subr.mxu1 %v559_v27  ;;  %1648 = vmatpush3.msra.mxu0 %v510_v28  ;;  %v591_v27 = vld [vmem:[%s2876_s3 + $0x6f0] sm:$0xff]  ;;  %v2612_v28 = vld.sshfl [vmem:[#allocation2 + $0x1c] sm:$0x33 pattern:$0x76325410] }
 0x10d   :  { %1681 = vmatpush3.msra.mxu1 %v543_v16  ;;  %1649 = vmatprep.subr.mxu0 %v525_v29  ;;  %v624_v16 = vld [vmem:[%s2876_s3 + $0x7f8] sm:$0xff] }
 0x10e   :  { %1682 = vmatprep.subr.mxu1 %v558_v30  ;;  %1650 = vmatpush3.msra.mxu0 %v509_v31  ;;  %v608_v29 = vld [vmem:[%s2876_s3 + $0x778] sm:$0xff]  ;;  %v1200_v30 = vcombine.high %v2612_v28, %v2612_v28  ;;  %v590_v31 = vld [vmem:[%s2876_s3 + $0x6e8] sm:$0xff] }
 0x10f   :  { %1683 = vmatpush3.msra.mxu1 %v542_v32  ;;  %1651 = vmatprep.subr.mxu0 %v524_v33  ;;  %v623_v32 = vld [vmem:[%s2876_s3 + $0x7f0] sm:$0xff]  ;;  %v574_v33 = vld [vmem:[%s2876_s3 + $0x668] sm:$0xff] }
 0x110   :  { %1684 = vmatprep.subr.mxu1 %v557_v34  ;;  %1652 = vmatpush3.msra.mxu0 %v508_v35  ;;  %v589_v34 = vld [vmem:[%s2876_s3 + $0x6e0] sm:$0xff]  ;;  %v622_v35 = vld [vmem:[%s2876_s3 + $0x7e8] sm:$0xff] }
 0x111   :  { %1685 = vmatpush3.msra.mxu1 %v541_v36  ;;  %1653 = vmatprep.subr.mxu0 %v523_v37  ;;  %v573_v36 = vld [vmem:[%s2876_s3 + $0x660] sm:$0xff]  ;;  %v606_v37 = vld [vmem:[%s2876_s3 + $0x768] sm:$0xff] }
 0x112   :  { %1686 = vmatprep.subr.mxu1 %v556_v38  ;;  %1654 = vmatpush3.msra.mxu0 %v507_v39  ;;  %v588_v38 = vld [vmem:[%s2876_s3 + $0x6d8] sm:$0xff]  ;;  %v621_v39 = vld [vmem:[%s2876_s3 + $0x7e0] sm:$0xff] }
 0x113   :  { %1687 = vmatpush3.msra.mxu1 %v540_v40  ;;  %1655 = vmatprep.subr.mxu0 %v522_v41  ;;  %v572_v40 = vld [vmem:[%s2876_s3 + $0x658] sm:$0xff]  ;;  %v605_v41 = vld [vmem:[%s2876_s3 + $0x760] sm:$0xff] }
 0x114   :  { %1688 = vmatprep.subr.mxu1 %v555_v42  ;;  %1656 = vmatpush3.msra.mxu0 %v506_v43  ;;  %v587_v42 = vld [vmem:[%s2876_s3 + $0x6d0] sm:$0xff]  ;;  %v620_v43 = vld [vmem:[%s2876_s3 + $0x7d8] sm:$0xff] }
 0x115   :  { %1689 = vmatpush3.msra.mxu1 %v539_v44  ;;  %1657 = vmatprep.subr.mxu0 %v521_v45  ;;  %v571_v44 = vld [vmem:[%s2876_s3 + $0x650] sm:$0xff]  ;;  %v604_v45 = vld [vmem:[%s2876_s3 + $0x758] sm:$0xff] }
 0x116   :  { %1690 = vmatprep.subr.mxu1 %v554_v46  ;;  %1658 = vmatpush3.msra.mxu0 %v505_v47  ;;  %v586_v46 = vld [vmem:[%s2876_s3 + $0x6c8] sm:$0xff]  ;;  %v619_v47 = vld [vmem:[%s2876_s3 + $0x7d0] sm:$0xff] }
 0x117   :  { %1691 = vmatpush3.msra.mxu1 %v538_v48  ;;  %1659 = vmatprep.subr.mxu0 %v520_v49  ;;  %v570_v48 = vld [vmem:[%s2876_s3 + $0x648] sm:$0xff]  ;;  %v603_v49 = vld [vmem:[%s2876_s3 + $0x750] sm:$0xff] }
 0x118   :  { %1692 = vmatprep.subr.mxu1 %v553_v50  ;;  %1660 = vmatpush3.msra.mxu0 %v504_v51  ;;  %v585_v50 = vld [vmem:[%s2876_s3 + $0x6c0] sm:$0xff]  ;;  %v618_v51 = vld [vmem:[%s2876_s3 + $0x7c8] sm:$0xff] }
 0x119   :  { %1693 = vmatpush3.msra.mxu1 %v537_v52  ;;  %1661 = vmatprep.subr.mxu0 %v519_v53  ;;  %v569_v52 = vld [vmem:[%s2876_s3 + $0x640] sm:$0xff]  ;;  %v602_v53 = vld [vmem:[%s2876_s3 + $0x748] sm:$0xff] }
 0x11a   :  { %1694 = vmatprep.subr.mxu1 %v552_v54  ;;  %1662 = vmatpush3.msra.mxu0 %v503_v55  ;;  %v584_v54 = vld [vmem:[%s2876_s3 + $0x6b8] sm:$0xff]  ;;  %v617_v55 = vld [vmem:[%s2876_s3 + $0x7c0] sm:$0xff] }
 0x11b   :  { %1695 = vmatpush3.msra.mxu1 %v536_v56  ;;  %1663 = vmatprep.subr.mxu0 %v518_v57  ;;  %v568_v56 = vld [vmem:[%s2876_s3 + $0x638] sm:$0xff]  ;;  %v601_v57 = vld [vmem:[%s2876_s3 + $0x740] sm:$0xff] }
 0x11c   :  { %1696 = vmatprep.subr.mxu1 %v551_v58  ;;  %1664 = vmatpush3.msra.mxu0 %v502_v59  ;;  %v583_v58 = vld [vmem:[%s2876_s3 + $0x6b0] sm:$0xff]  ;;  %v616_v59 = vld [vmem:[%s2876_s3 + $0x7b8] sm:$0xff] }
 0x11d   :  { %1697 = vmatpush3.msra.mxu1 %v535_v60  ;;  %1665 = vmatprep.subr.mxu0 %v517_v61  ;;  %v567_v60 = vld [vmem:[%s2876_s3 + $0x630] sm:$0xff]  ;;  %v600_v61 = vld [vmem:[%s2876_s3 + $0x738] sm:$0xff] }
 0x11e   :  { %1698 = vmatprep.subr.mxu1 %v550_v62  ;;  %1666 = vmatpush3.msra.mxu0 %v501_v63  ;;  %v582_v62 = vld [vmem:[%s2876_s3 + $0x6a8] sm:$0xff]  ;;  %v615_v63 = vld [vmem:[%s2876_s3 + $0x7b0] sm:$0xff] }
 0x11f   :  { %1699 = vmatpush3.msra.mxu1 %v534_v0  ;;  %1667 = vmatprep.subr.mxu0 %v516_v1  ;;  %v566_v0 = vld [vmem:[%s2876_s3 + $0x628] sm:$0xff]  ;;  %v599_v1 = vld [vmem:[%s2876_s3 + $0x730] sm:$0xff] }
 0x120   :  { %1700 = vmatprep.subr.mxu1 %v549_v2  ;;  %1668 = vmatpush3.msra.mxu0 %v500_v3  ;;  %v581_v2 = vld [vmem:[%s2876_s3 + $0x6a0] sm:$0xff]  ;;  %v614_v3 = vld [vmem:[%s2876_s3 + $0x7a8] sm:$0xff] }
 0x121   :  { %1701 = vmatpush3.msra.mxu1 %v533_v4  ;;  %1669 = vmatprep.subr.mxu0 %v515_v5  ;;  %v565_v4 = vld [vmem:[%s2876_s3 + $0x620] sm:$0xff]  ;;  %v598_v5 = vld [vmem:[%s2876_s3 + $0x728] sm:$0xff] }
 0x122   :  { %1702 = vmatprep.subr.mxu1 %v548_v6  ;;  %1670 = vmatpush3.msra.mxu0 %v499_v7  ;;  %v580_v6 = vld [vmem:[%s2876_s3 + $0x698] sm:$0xff]  ;;  %v613_v7 = vld [vmem:[%s2876_s3 + $0x7a0] sm:$0xff] }
 0x123   :  { %1703 = vmatpush3.msra.mxu1 %v532_v8  ;;  %1671 = vmatprep.subr.mxu0 %v514_v9  ;;  %v564_v8 = vld [vmem:[%s2876_s3 + $0x618] sm:$0xff]  ;;  %v597_v9 = vld [vmem:[%s2876_s3 + $0x720] sm:$0xff] }
 0x124   :  { %1704 = vmatprep.subr.mxu1 %v547_v10  ;;  %1672 = vmatpush3.msra.mxu0 %v498_v11  ;;  %v579_v10 = vld [vmem:[%s2876_s3 + $0x690] sm:$0xff]  ;;  %v612_v11 = vld [vmem:[%s2876_s3 + $0x798] sm:$0xff] }
 0x125   :  { %1705 = vmatpush3.msra.mxu1 %v531_v12  ;;  %1673 = vmatprep.subr.mxu0 %v513_v15  ;;  %v563_v12 = vld [vmem:[%s2876_s3 + $0x610] sm:$0xff]  ;;  %v596_v15 = vld [vmem:[%s2876_s3 + $0x718] sm:$0xff] }
 0x126   :  { %1706 = vmatprep.subr.mxu1 %v546_v18  ;;  %1674 = vmatpush3.msra.mxu0 %v497_v19  ;;  %v578_v18 = vld [vmem:[%s2876_s3 + $0x688] sm:$0xff]  ;;  %v611_v19 = vld [vmem:[%s2876_s3 + $0x790] sm:$0xff] }
 0x127   :  { %1707 = vmatpush3.msra.mxu1 %v530_v20  ;;  %1025 = vmatmul.mubr.f32.vlgmr.msra.gmra.mxu0 %v2393_v14  ;;  %v575_v14 = vld [vmem:[%s2876_s3 + $0x670] sm:$0xff]  ;;  %v562_v20 = vld [vmem:[%s2876_s3 + $0x608] sm:$0xff] }
 0x128   :  { %1708 = vmatprep.subr.mxu1 %v545_v21  ;;  %1713 = vmatprep.subr.mxu0 %v592_v13  ;;  %v595_v21 = vld [vmem:[%s2876_s3 + $0x710] sm:$0xff]  ;;  %v577_v13 = vld [vmem:[%s2876_s3 + $0x680] sm:$0xff] }
 0x129   :  { %1709 = vmatpush3.msra.mxu1 %v529_v24  ;;  %1714 = vmatpush3.msra.mxu0 %v576_v25  ;;  %v610_v24 = vld [vmem:[%s2876_s3 + $0x788] sm:$0xff]  ;;  %v561_v25 = vld [vmem:[%s2876_s3 + $0x600] sm:$0xff] }
 0x12a   :  { %1186 = vmatprep.mubr.f32.mxu0 %v1119_v26  ;;  %1106 = vmatmul.mubr.f32.vlgmr.msra.gmra.mxu1 %v2410_v22  ;;  %v607_v22 = vld [vmem:[%s2876_s3 + $0x770] sm:$0xff]  ;;  %v594_v26 = vld [vmem:[%s2876_s3 + $0x708] sm:$0xff] }
 0x12b   :  { %1715 = vmatprep.subr.mxu0 %v591_v27  ;;  %1748 = vmatprep.subr.mxu1 %v624_v16  ;;  %v609_v27 = vld [vmem:[%s2876_s3 + $0x780] sm:$0xff] }
 0x12c   :  { %1716 = vmatpush3.msra.mxu0 %v575_v14  ;;  %1749 = vmatpush3.msra.mxu1 %v608_v29  ;;  %v593_v16 = vld [vmem:[%s2876_s3 + $0x700] sm:$0xff]  ;;  %v1305_v14 = vld [vmem:[%s2878_s5 + $0x38] sm:$0xff]  ;;  %v1304_v29 = vld [vmem:[%s2878_s5 + $0x30] sm:$0xff] }
 0x12d   :  { %1267 = vmatprep.mubr.f32.mxu1 %v1200_v30  ;;  %1717 = vmatprep.subr.mxu0 %v590_v31  ;;  %v1301_v30 = vld [vmem:[%s2878_s5 + $0x18] sm:$0xff]  ;;  %v1300_v31 = vld [vmem:[%s2878_s5 + $0x10] sm:$0xff] }
 0x12e   :  { %1750 = vmatprep.subr.mxu1 %v623_v32  ;;  %1718 = vmatpush3.msra.mxu0 %v574_v33  ;;  %v1299_v32 = vld [vmem:[%s2878_s5 + $0x8] sm:$0xff]  ;;  %v1298_v33 = vld [vmem:[%s2878_s5] sm:$0xff] }
 0x12f   :  { %1751 = vmatpush3.msra.mxu1 %v607_v22  ;;  %1719 = vmatprep.subr.mxu0 %v589_v34  ;;  %v1391_v22 = vld [vmem:[%s2880_s7 + $0x18] sm:$0xff] }
 0x130   :  { %1752 = vmatprep.subr.mxu1 %v622_v35  ;;  %1720 = vmatpush3.msra.mxu0 %v573_v36 }
 0x131   :  { %1753 = vmatpush3.msra.mxu1 %v606_v37  ;;  %1721 = vmatprep.subr.mxu0 %v588_v38 }
 0x132   :  { %1754 = vmatprep.subr.mxu1 %v621_v39  ;;  %1722 = vmatpush3.msra.mxu0 %v572_v40 }
 0x133   :  { %1755 = vmatpush3.msra.mxu1 %v605_v41  ;;  %1723 = vmatprep.subr.mxu0 %v587_v42 }
 0x134   :  { %1756 = vmatprep.subr.mxu1 %v620_v43  ;;  %1724 = vmatpush3.msra.mxu0 %v571_v44 }
 0x135   :  { %1757 = vmatpush3.msra.mxu1 %v604_v45  ;;  %1725 = vmatprep.subr.mxu0 %v586_v46 }
 0x136   :  { %1758 = vmatprep.subr.mxu1 %v619_v47  ;;  %1726 = vmatpush3.msra.mxu0 %v570_v48 }
 0x137   :  { %1759 = vmatpush3.msra.mxu1 %v603_v49  ;;  %1727 = vmatprep.subr.mxu0 %v585_v50 }
 0x138   :  { %1760 = vmatprep.subr.mxu1 %v618_v51  ;;  %1728 = vmatpush3.msra.mxu0 %v569_v52 }
 0x139   :  { %1761 = vmatpush3.msra.mxu1 %v602_v53  ;;  %1729 = vmatprep.subr.mxu0 %v584_v54 }
 0x13a   :  { %1762 = vmatprep.subr.mxu1 %v617_v55  ;;  %1730 = vmatpush3.msra.mxu0 %v568_v56 }
 0x13b   :  { %1763 = vmatpush3.msra.mxu1 %v601_v57  ;;  %1731 = vmatprep.subr.mxu0 %v583_v58 }
 0x13c   :  { %1764 = vmatprep.subr.mxu1 %v616_v59  ;;  %1732 = vmatpush3.msra.mxu0 %v567_v60 }
 0x13d   :  { %1765 = vmatpush3.msra.mxu1 %v600_v61  ;;  %1733 = vmatprep.subr.mxu0 %v582_v62 }
 0x13e   :  { %1766 = vmatprep.subr.mxu1 %v615_v63  ;;  %1734 = vmatpush3.msra.mxu0 %v566_v0 }
 0x13f   :  { %1767 = vmatpush3.msra.mxu1 %v599_v1  ;;  %1735 = vmatprep.subr.mxu0 %v581_v2 }
 0x140   :  { %1768 = vmatprep.subr.mxu1 %v614_v3  ;;  %1736 = vmatpush3.msra.mxu0 %v565_v4 }
 0x141   :  { %1769 = vmatpush3.msra.mxu1 %v598_v5  ;;  %1737 = vmatprep.subr.mxu0 %v580_v6 }
 0x142   :  { %1770 = vmatprep.subr.mxu1 %v613_v7  ;;  %1738 = vmatpush3.msra.mxu0 %v564_v8  ;;  %v1498_v8 = vld [vmem:[%s2877_s4] ss:$0 sm:$0xff] }
 0x143   :  { %1771 = vmatpush3.msra.mxu1 %v597_v9  ;;  %1739 = vmatprep.subr.mxu0 %v579_v10 }
 0x144   :  { %1772 = vmatprep.subr.mxu1 %v612_v11  ;;  %1740 = vmatpush3.msra.mxu0 %v563_v12  ;;  %v1390_v12 = vld [vmem:[%s2880_s7 + $0x10] sm:$0xff] }
 0x145   :  { %1773 = vmatpush3.msra.mxu1 %v596_v15  ;;  %1741 = vmatprep.subr.mxu0 %v578_v18  ;;  %v1389_v15 = vld [vmem:[%s2880_s7 + $0x8] sm:$0xff]  ;;  %v1388_v18 = vld [vmem:[%s2880_s7] sm:$0xff]  ;;  %s1833_s7 = scalar_lea.vmem %s1481_s11, 32 }
 0x146   :  { %1774 = vmatprep.subr.mxu1 %v611_v19  ;;  %1742 = vmatpush3.msra.mxu0 %v562_v20  ;;  %v1499_v19 = vld [vmem:[%s2879_s6] ss:$0 sm:$0xff]  ;;  %p1834_p0 = scmp.ne.s32.totalorder %s1481_s11, %s1833_s7  ;;  %p1839_p2 = scmp.lt.s32.totalorder %s1833_s7, %s1833_s7 }
 0x147   :  { %1775 = vmatpush3.msra.mxu1 %v595_v21  ;;  %1743 = vmatprep.subr.mxu0 %v577_v13 }
 0x148   :  { %1776 = vmatprep.subr.mxu1 %v610_v24  ;;  %1744 = vmatpush3.msra.mxu0 %v561_v25  ;;  %v1501_v25 = vld [vmem:[%s2881_s8] ss:$0 sm:$0xff]  ;;  %p1840_p3 = por %p1839_p2, %p1838_p1 }
 0x149   :  { %1777 = vmatpush3.msra.mxu1 %v594_v26  ;;  %1187 = vmatmul.mubr.f32.vlgmr.msra.gmra.mxu0 %v2595_v23  ;;  %v1303_v23 = vld [vmem:[%s2878_s5 + $0x28] sm:$0xff] }
 0x14a   :  { %1778 = vmatprep.subr.mxu1 %v609_v27  ;;  %1797 = vmatprep.subr.mxu0 %v1855_v17  ;;  %p1841_p4 = pnand %p1840_p3, %p1834_p0 }
 0x14b   :  { %1779 = vmatpush3.msra.mxu1 %v593_v16  ;;  %1798 = vmatpush3.msra.mxu0 %v1305_v14 }
 0x14c   :  { %1268 = vmatmul.mubr.f32.vlgmr.msra.gmra.mxu1 %v2612_v28  ;;  %1816 = vmatprep.subr.mxu1 %v1855_v17  ;;  %v1302_v28 = vld [vmem:[%s2878_s5 + $0x20] sm:$0xff] }
 0x14d   :  { %1799 = vmatprep.subr.mxu0 %v1855_v17  ;;  %1813 = vmatprep.mubr.msk.f32.mxu0 %vm1858_vm2, %v1855_v17 }
 0x14e   :  { %1800 = vmatpush3.msra.mxu0 %v1304_v29  ;;  %1824 = vmatprep.mubr.msk.f32.mxu1 %vm1858_vm2, %v1855_v17 }
 0x14f   :  { %1801 = vmatprep.subr.mxu0 %v1855_v17  ;;  %1817 = vmatpush3.msra.mxu1 %v1391_v22 }
 0x150   :  { %1802 = vmatpush3.msra.mxu0 %v1303_v23  ;;  %1818 = vmatprep.subr.mxu1 %v1855_v17 }
 0x151   :  { %1803 = vmatprep.subr.mxu0 %v1855_v17  ;;  %1819 = vmatpush3.msra.mxu1 %v1390_v12 }
 0x152   :  { %1804 = vmatpush3.msra.mxu0 %v1302_v28  ;;  %1820 = vmatprep.subr.mxu1 %v1855_v17 }
 0x153   :  { %1805 = vmatprep.subr.mxu0 %v1855_v17  ;;  %1821 = vmatpush3.msra.mxu1 %v1389_v15 }
 0x154   :  { %1806 = vmatpush3.msra.mxu0 %v1301_v30  ;;  %1822 = vmatprep.subr.mxu1 %v1855_v17 }
 0x155   :  { %1807 = vmatprep.subr.mxu0 %v1855_v17  ;;  %1823 = vmatpush3.msra.mxu1 %v1388_v18 }
 0x156   :  { %1808 = vmatpush3.msra.mxu0 %v1300_v31 }
 0x157   :  { %1809 = vmatprep.subr.mxu0 %v1855_v17 }
 0x158   :  { %1810 = vmatpush3.msra.mxu0 %v1299_v32 }
 0x159   :  { %1811 = vmatprep.subr.mxu0 %v1855_v17 }
 0x15a   :  { %1812 = vmatpush3.msra.mxu0 %v1298_v33 }
 0x1a4   :  { %v1535_v34 = vpop.f32.mrf.mxu0 }
 0x1a6   :  { %v1536_v35 = vpop.f32.mrf.mxu0 }
 0x1a7   :  { %v1570_v36 = vpop.f32.mrf.mxu1  ;;  %v1537_v43 = vadd.f32 %v1536_v35, %v1535_v34 }
 0x1a9   :  { %v1571_v38 = vpop.f32.mrf.mxu1  ;;  %v1274_v49 = vsel %vm1273_vm3, %v1537_v43, 0.0 }
 0x1aa   :  { %v1572_v41 = vadd.f32 %v1571_v38, %v1570_v36 }
 0x1ac   :  { %v1275_v46 = vsel %vm1273_vm3, %v1572_v41, 0.0 }
 0x1ad   :  { %v1276_v52 = vadd.f32 %v1275_v46, %v1274_v49 }
 0x1c5   :  { %v1605_v37 = vpop.f32.mrf.mxu0 }
 0x1c7   :  { %v1606_v39 = vpop.f32.mrf.mxu0 }
 0x1c8   :  { %v1640_v40 = vpop.f32.mrf.mxu1  ;;  %v1607_v44 = vadd.f32 %v1606_v39, %v1605_v37 }
 0x1ca   :  { %v1641_v45 = vpop.f32.mrf.mxu1  ;;  %v1277_v50 = vsel %vm1273_vm3, %v1607_v44, 0.0 }
 0x1cb   :  { %v1642_v51 = vadd.f32 %v1641_v45, %v1640_v40  ;;  %v1278_v54 = vadd.f32 %v1277_v50, %v1276_v52 }
 0x1cd   :  { %v1279_v56 = vsel %vm1273_vm3, %v1642_v51, 0.0 }
 0x1ce   :  { %v1280_v59 = vadd.f32 %v1279_v56, %v1278_v54 }
 0x1e7   :  { %v1675_v42 = vpop.f32.mrf.mxu0 }
 0x1e9   :  { %v1676_v47 = vpop.f32.mrf.mxu0 }
 0x1ea   :  { %v1710_v48 = vpop.f32.mrf.mxu1  ;;  %v1677_v53 = vadd.f32 %v1676_v47, %v1675_v42 }
 0x1ec   :  { %v1711_v55 = vpop.f32.mrf.mxu1  ;;  %v1281_v57 = vsel %vm1273_vm3, %v1677_v53, 0.0 }
 0x1ed   :  { %v1712_v58 = vadd.f32 %v1711_v55, %v1710_v48  ;;  %v1282_v60 = vadd.f32 %v1281_v57, %v1280_v59 }
 0x1ef   :  { %v1283_v62 = vsel %vm1273_vm3, %v1712_v58, 0.0 }
 0x1f0   :  { %v1284_v2 = vadd.f32 %v1283_v62, %v1282_v60 }
 0x209   :  { %v1745_v61 = vpop.f32.mrf.mxu0 }
 0x20b   :  { %v1746_v63 = vpop.f32.mrf.mxu0 }
 0x20c   :  { %v1780_v0 = vpop.f32.mrf.mxu1  ;;  %v1747_v1 = vadd.f32 %v1746_v63, %v1745_v61 }
 0x20e   :  { %v1781_v3 = vpop.f32.mrf.mxu1  ;;  %v1285_v4 = vsel %vm1273_vm3, %v1747_v1, 0.0 }
 0x20f   :  { %v1782_v5 = vadd.f32 %v1781_v3, %v1780_v0  ;;  %v1286_v6 = vadd.f32 %v1285_v4, %v1284_v2 }
 0x211   :  { %v1287_v7 = vsel %vm1273_vm3, %v1782_v5, 0.0 }
 0x212   :  { %v1288_v9 = vadd.f32 %v1287_v7, %v1286_v6 }
 0x214   :  { %v1296_v10 = vadd.f32 %v1498_v8, %v1288_v9 }
 0x216   :  { %v1297_v11 = vmax.f32 %v1296_v10, 0.0 }
 0x218   :  { %1814 = vmatmul.mubr.msk.f32.vlgmr.msra.gmra.mxu0 %vm1313_vm4, %v1297_v11 }
 0x2d8   :  { %v1383_v20 = vpop.f32.mrf.mxu0 }
 0x2d9   :  { %v1384_v21 = vadd.f32 %v1499_v19, %v1383_v20 }
 0x2da   :  { %v1815_v13 = vpop.f32.mrf.mxu0 }
 0x2db   :  { %v1387_v24 = vmax.f32 %v1384_v21, 0.0 }
 0x2dd   :  { %1825 = vmatmul.mubr.msk.f32.vlgmr.msra.gmra.mxu1 %vm56_vm0, %v1387_v24 }
 0x39d   :  { %v1468_v17 = vpop.f32.mrf.mxu1 }
 0x39e   :  { %v1469_v26 = vadd.f32 %v1501_v25, %v1468_v17 }
 0x39f   :  { %v1826_v27 = vpop.f32.mrf.mxu1 }
 0x3a0   :  { %1473 = vst.msk [vmem:[#allocation3] sm:$0x3] %vm1472_vm5, %v1469_v26 }
 0x3a1   :  { %1844 = shalt.err (!%p1841_p4)
}
 0x3a2   :  { %1483 = dma.vmem_to_hbm [thread:$0]  %s1481_s11, 32, %s2882_s9, [#allocation4]  }
 0x3a3   :  { %1853 = dma.done.wait [#allocation4], 32  }
 0x3a4   :  { %1854 = vsyncadd [#allocation4], 4294967264 }
 0x3a5   :  { %1487 = vsyncpa [#allocation4], 1 }

</bundles_post_ra>
